<compile_context>
chip_gen: v7x
topology: tpu7x:2x2x1
jax: 0.10.0
libtpu: 0.0.40
codegen_flags: <defaults>
</compile_context>

<pallas_src>
import functools

import jax
import jax.numpy as jnp
from jax.experimental import pallas as pl
from jax.experimental.pallas import tpu as pltpu


_LANE = 1024                          # preferred lane-dense trailing dim (8 x 128)
_SUBLANE_MIN = {4: 8, 2: 16, 1: 32}   # min second-to-last tile dim per itemsize


def _piecewise_kernel(x_ref, o_ref, *, min_val, inv_range):
    """Elementwise clamp((x - min_val) * inv_range, 0, 1) on one lane-dense block."""
    x = x_ref[...]
    if jnp.issubdtype(x.dtype, jnp.floating):
        # Python-float constants are weakly typed -> math stays in the input
        # dtype (bf16 VPU on v6e/v7x, f32 otherwise). Pure VPU, no MXU.
        y = jnp.clip((x - min_val) * inv_range, 0.0, 1.0)
    else:
        y = jnp.clip((x.astype(jnp.float32) - min_val) * inv_range, 0.0, 1.0)
    o_ref[...] = y.astype(o_ref.dtype)


def _target_block_bytes():
    """Per-generation block-size target (bytes per input block)."""
    try:
        kind = jax.devices()[0].device_kind.lower()
    except Exception:  # pragma: no cover - defensive
        kind = ""
    if "v7" in kind or "tpu7" in kind:
        return 8 << 20   # v7x: ~3.2 TB/s HBM, amortize per-step overhead hard
    if "v6" in kind:
        return 4 << 20   # v6e: fits 32 MiB scoped VMEM double-buffered
    return 2 << 20       # v4/v5e/unknown: conservative (16 MiB default scoped VMEM)


def _choose_cols(n):
    """Pick lane-dense column count; returns (cols, needs_pad)."""
    if n % _LANE == 0:
        return _LANE, False
    if n % 128 == 0:
        return 128, False
    return _LANE, True


def piecewise_activation(x, min_val=0.0, max_val=1.0, *, donate_input=False):
    """Pallas implementation of PiecewiseActivation.forward for any input shape."""
    inv_range = 1.0 / (max_val - min_val)
    orig_shape, dtype = x.shape, x.dtype
    n = x.size
    if n == 0:
        return x

    itemsize = jnp.dtype(dtype).itemsize
    cols, needs_pad = _choose_cols(n)

    # Lane-dense 2-D view. Reshape of a contiguous array is free; pad only on
    # the misaligned slow path (<= _LANE - 1 extra elements).
    x_flat = jnp.ravel(x)
    if needs_pad:
        x_flat = jnp.pad(x_flat, (0, (-n) % cols))
    rows = x_flat.size // cols
    x2d = x_flat.reshape(rows, cols)

    # Block sizing: per-generation byte target, rounded to the dtype's sublane
    # minimum. A block equal to the full rows dim is always legal; otherwise
    # the last (ragged) block is masked by Pallas automatically.
    sub_min = _SUBLANE_MIN.get(itemsize, 8)
    target_rows = max(_target_block_bytes() // (cols * itemsize), sub_min)
    target_rows = (target_rows // sub_min) * sub_min
    block_rows = rows if rows <= target_rows else target_rows
    grid = (pl.cdiv(rows, block_rows),)

    block_bytes = block_rows * cols * itemsize
    # in + out, double-buffered, plus margin; capped to leave headroom on v7x.
    vmem_limit = int(min(max(4 * block_bytes + (4 << 20), 16 << 20), 48 << 20))

    kernel = functools.partial(
        _piecewise_kernel, min_val=float(min_val), inv_range=float(inv_range)
    )
    cost = pl.CostEstimate(
        flops=4 * n, transcendentals=0, bytes_accessed=2 * n * itemsize
    )

    out2d = pl.pallas_call(
        kernel,
        out_shape=jax.ShapeDtypeStruct((rows, cols), dtype),
        grid=grid,
        in_specs=[pl.BlockSpec((block_rows, cols), lambda i: (i, 0))],
        out_specs=pl.BlockSpec((block_rows, cols), lambda i: (i, 0)),
        compiler_params=pltpu.CompilerParams(
            dimension_semantics=("parallel",),
            vmem_limit_bytes=vmem_limit,
        ),
        cost_estimate=cost,
        input_output_aliases={0: 0} if (donate_input and not needs_pad) else {},
    )(x2d)

    if needs_pad:
        return out2d.reshape(-1)[:n].reshape(orig_shape)
    return out2d.reshape(orig_shape)


def _reference(x, min_val=0.0, max_val=1.0):
    """Pure-JAX reference mirroring the PyTorch forward (f32 math)."""
    inv_range = 1.0 / (max_val - min_val)
    return jnp.clip((x.astype(jnp.float32) - min_val) * inv_range, 0.0, 1.0).astype(x.dtype)


if __name__ == "__main__":
    key = jax.random.PRNGKey(0)
    k1, k2, k3 = jax.random.split(key, 3)

    # --- primary test: module defaults, lane-aligned fast path (no pad/slice)
    x = 2.0 * jax.random.normal(k1, (2, 4, 16, 16), jnp.float32)
    out = jax.block_until_ready(piecewise_activation(x, 0.0, 1.0))
    ref = jax.block_until_ready(_reference(x, 0.0, 1.0))
    assert out.shape == x.shape and out.dtype == x.dtype
    assert jnp.allclose(out, ref, atol=1e-6, rtol=1e-6), "f32 aligned mismatch"

    # --- misaligned shape: exercises the pad + ragged-tail slow path
    x_odd = 3.0 * jax.random.normal(k2, (3, 5, 7), jnp.float32)
    out_odd = jax.block_until_ready(piecewise_activation(x_odd, -1.0, 3.0))
    ref_odd = jax.block_until_ready(_reference(x_odd, -1.0, 3.0))
    assert out_odd.shape == x_odd.shape and out_odd.dtype == x_odd.dtype
    assert jnp.allclose(out_odd, ref_odd, atol=1e-6, rtol=1e-6), "misaligned mismatch"

    # --- bf16: compute stays in bf16 (no unconditional f32 upcast)
    x_bf = (2.0 * jax.random.normal(k3, (2, 8, 32, 32), jnp.float32)).astype(jnp.bfloat16)
    out_bf = jax.block_until_ready(piecewise_activation(x_bf, 0.0, 1.0))
    ref_bf = _reference(x_bf, 0.0, 1.0)
    assert out_bf.dtype == jnp.bfloat16 and out_bf.shape == x_bf.shape
    assert jnp.allclose(out_bf.astype(jnp.float32), ref_bf.astype(jnp.float32),
                        atol=1e-2), "bf16 mismatch"

    print("KERNEL_OK")
</pallas_src>

<mosaic_0001>
module attributes {stable_mosaic.version = 11 : i64} {
  func.func @_piecewise_kernel(%arg0: i32, %arg1: memref<2x1024xf32, #tpu.memory_space<vmem>>, %arg2: memref<2x1024xf32, #tpu.memory_space<vmem>>) attributes {dimension_semantics = [#tpu.dimension_semantics<parallel>], iteration_bounds = array<i64: 1>, scalar_prefetch = 0 : i64, scratch_operands = 0 : i64, tpu.core_type = #tpu.core_type<tc>, window_params = [{transform_indices = @transform_0, window_bounds = array<i64: 2, 1024>}, {transform_indices = @transform_1, window_bounds = array<i64: 2, 1024>}]} {
    %c0 = arith.constant 0 : index
    %c0_0 = arith.constant 0 : index
    %0 = vector.load %arg1[%c0, %c0_0] : memref<2x1024xf32, #tpu.memory_space<vmem>>, vector<2x1024xf32>
    %cst = arith.constant 0.000000e+00 : f32
    %1 = vector.broadcast %cst : f32 to vector<2x1024xf32>
    %2 = arith.subf %0, %1 : vector<2x1024xf32>
    %cst_1 = arith.constant 1.000000e+00 : f32
    %3 = vector.broadcast %cst_1 : f32 to vector<2x1024xf32>
    %4 = arith.mulf %2, %3 : vector<2x1024xf32>
    %cst_2 = arith.constant 0.000000e+00 : f32
    %cst_3 = arith.constant 1.000000e+00 : f32
    %5 = vector.broadcast %cst_2 : f32 to vector<2x1024xf32>
    %6 = arith.maximumf %5, %4 : vector<2x1024xf32>
    %7 = vector.broadcast %cst_3 : f32 to vector<2x1024xf32>
    %8 = arith.minimumf %7, %6 : vector<2x1024xf32>
    %c0_4 = arith.constant 0 : index
    %c0_5 = arith.constant 0 : index
    %9 = vector.load %arg2[%c0_4, %c0_5] : memref<2x1024xf32, #tpu.memory_space<vmem>>, vector<2x1024xf32>
    tpu.vector_store %arg2[%c0_4, %c0_5], %8 {strides = array<i32>} : memref<2x1024xf32, #tpu.memory_space<vmem>>, vector<2x1024xf32>,
    return
  }
  func.func @transform_0(%arg0: i32) -> (i32, i32) {
    %c0_i32 = arith.constant 0 : i32
    %c0_i32_0 = arith.constant 0 : i32
    return %arg0, %c0_i32 : i32, i32
  }
  func.func @transform_1(%arg0: i32) -> (i32, i32) {
    %c0_i32 = arith.constant 0 : i32
    %c0_i32_0 = arith.constant 0 : i32
    return %arg0, %c0_i32 : i32, i32
  }
}

</mosaic_0001>

<bundles_post_ra>
// kernel: tpu_custom_call.1
= control target key start
LH: loop header
LB: loop body
LE: loop exit
PB: predicated region body
PF: predicated region fallthrough
CT: control target
= control target key end

     0   :  { %6 = vsyncpa [#allocation3], 0  ;;  %s130_s0 = inlined_call_operand.hbm [shape: f32[2,1024], index: 0, kind: input, shape index: {}]   ;;  %s131_s1 = inlined_call_operand.hbm [shape: f32[2,1024], index: 1, kind: output, shape index: {}]  }
   0x1   :  { %7 = vsyncpa [#allocation4], 0  ;;  %s94_s6 = smov [#allocation2]   ;;  %s46_s10 = scalar_lea.hbm %s130_s0, 256 }
   0x2   :  { %s14_s7 = sshll.u32 %s94_s6, 4  ;;  %p47_p0 = scmp.ne.s32.totalorder %s130_s0, %s46_s10  ;;  %s15_s7 = int_to_ptr.vmem [resolvable:$true] %s14_s7 }
   0x3   :  { %p50_p1 = scmp.lt.u32.totalorder %s46_s10, %s130_s0 }
   0x5   :  { %p52_p2 = pnand %p50_p1, %p47_p0 }
   0x7   :  { %55 = shalt.err (!%p52_p2)
}
   0x8   :  { %s56_s15 = scalar_lea.vmem %s15_s7, 256  ;;  %p61_p4 = scmp.lt.s32.totalorder %s15_s7, %s15_s7 }
   0x9   :  { %p57_p3 = scmp.ne.s32.totalorder %s15_s7, %s56_s15  ;;  %p62_p5 = scmp.lt.s32.totalorder %s56_s15, %s56_s15 }
   0xb   :  { %p63_p6 = por %p62_p5, %p61_p4 }
   0xd   :  { %p64_p7 = pnand %p63_p6, %p57_p3 }
   0xf   :  { %67 = shalt.err (!%p64_p7)
}
  0x10   :  { %17 = dma.hbm_to_vmem [thread:$0]  %s130_s0, 256, %s15_s7, [#allocation3]  }
  0x11   :  { %90 = dma.done.wait [#allocation3], 256  }
  0x12   :  { %91 = vsyncadd [#allocation3], 4294967040  ;;  %v21_v0 = vld [vmem:[#allocation2] sm:$0xff]  ;;  %v22_v1 = vld [vmem:[#allocation2 + $0x8] sm:$0xff]  ;;  %s95_s18 = smov [#allocation5]  }
  0x13   :  { %s35_s19 = sshll.u32 %s95_s18, 4  ;;  %v23_v2 = vmax.f32 %v21_v0, 0.0  ;;  %v24_v3 = vmax.f32 %v22_v1, 0.0  ;;  %s36_s19 = int_to_ptr.vmem [resolvable:$true] %s35_s19 }
  0x14   :  { %s68_s20 = scalar_lea.vmem %s36_s19, 256  ;;  %p73_p9 = scmp.lt.s32.totalorder %s36_s19, %s36_s19 }
  0x15   :  { %v25_v4 = vmin.f32 %v23_v2, 1.0  ;;  %v26_v5 = vmin.f32 %v24_v3, 1.0  ;;  %p69_p8 = scmp.ne.s32.totalorder %s36_s19, %s68_s20  ;;  %p74_p10 = scmp.lt.s32.totalorder %s68_s20, %s68_s20 }
  0x17   :  { %27 = vst [vmem:[#allocation5] sm:$0xff] %v25_v4  ;;  %28 = vst [vmem:[#allocation5 + $0x8] sm:$0xff] %v26_v5  ;;  %p75_p11 = por %p74_p10, %p73_p9 }
  0x19   :  { %p76_p12 = pnand %p75_p11, %p69_p8 }
  0x1b   :  { %79 = shalt.err (!%p76_p12)
}
  0x1c   :  { %s80_s22 = scalar_lea.hbm %s131_s1, 256 }
  0x1d   :  { %p81_p13 = scmp.ne.s32.totalorder %s131_s1, %s80_s22  ;;  %p84_p0 = scmp.lt.u32.totalorder %s80_s22, %s131_s1 }
  0x1f   :  { %p86_p1 = pnand %p84_p0, %p81_p13 }
  0x21   :  { %89 = shalt.err (!%p86_p1)
}
  0x22   :  { %38 = dma.vmem_to_hbm [thread:$0]  %s36_s19, 256, %s131_s1, [#allocation4]  }
  0x23   :  { %92 = dma.done.wait [#allocation4], 256  }
  0x24   :  { %93 = vsyncadd [#allocation4], 4294967040 }
  0x25   :  { %42 = vsyncpa [#allocation3], 1 }
  0x26   :  { %43 = vsyncpa [#allocation4], 1 }

</bundles_post_ra>
